<compile_context>
chip_gen: v7x
topology: tpu7x:2x2x1
jax: 0.10.0
libtpu: 0.0.40
codegen_flags: <defaults>
</compile_context>

<pallas_src>
import math
from functools import partial

import jax
import jax.numpy as jnp
from jax.experimental import pallas as pl
from jax.experimental.pallas import tpu as pltpu

LANE = 128      # TPU lane width
SUBLANE = 8


def _round_up(n, m):
    return ((n + m - 1) // m) * m


# --------------------------------- kernel ---------------------------------

def _residual_policy_kernel(x_ref, a_ref, w1x_ref, w1a_ref, b1_ref,
                            w2_ref, b2_ref, wfc_ref, bfc_ref, o_ref,
                            *, scale, action_size):
    x = x_ref[...]                       # (tile_b, OBS_P)  f32
    a = a_ref[...]                       # (tile_b, A)      f32, unpadded lanes

    # encoder layer 1: Linear(concat([x, action])) + ReLU, with the weight pre-split.
    h = jnp.dot(x, w1x_ref[...], preferred_element_type=jnp.float32) + b1_ref[...]
    # action contribution: A is tiny and static, so a per-action broadcast-MAC on the
    # VPU is cheaper and safer than a degenerate K=A MXU matmul (and avoids the old
    # 128-lane padded action input entirely).
    for j in range(action_size):
        h = h + a[:, j:j + 1] * w1a_ref[j:j + 1, :]
    h = jnp.maximum(h, 0.0)

    # encoder layer 2: Linear + ReLU (HID padded to a lane multiple -> dense vregs)
    h = jnp.dot(h, w2_ref[...], preferred_element_type=jnp.float32) + b2_ref[...]
    h = jnp.maximum(h, 0.0)

    # fc head: N padded to a lane multiple for the MXU; only the first A lanes are real.
    res = jnp.dot(h, wfc_ref[...], preferred_element_type=jnp.float32) + bfc_ref[...]
    res = res[:, :action_size]           # (tile_b, A)

    # residual squash + clamp (all f32); padded batch rows are sliced off in the wrapper.
    o_ref[...] = jnp.clip(a + scale * jnp.tanh(res), -1.0, 1.0)


# ------------------------------ host wrappers ------------------------------

def pack_residual_policy_params(params, obs_dim):
    """One-time packing of DeterministicResidualPolicy parameters (call at load time).

    params: dict with (in_features, out_features)-layout weights
      w1 (obs_dim + A, HID), b1 (1, HID)   -- encoder layer 1
      w2 (HID, HID),         b2 (1, HID)   -- encoder layer 2
      wfc (HID, A),          bfc (1, A)    -- residual head
    """
    w1, b1 = params["w1"], params["b1"]
    w2, b2 = params["w2"], params["b2"]
    wfc, bfc = params["wfc"], params["bfc"]

    hid = w2.shape[0]
    act = wfc.shape[1]
    obs_p = _round_up(max(obs_dim, 1), SUBLANE)
    hid_p = _round_up(hid, LANE)          # lane-dense intermediates / clean MXU tiles
    act_p = _round_up(act, LANE)          # MXU-friendly head; sliced back to A in-kernel

    def pad2(t, rows, cols):
        t = jnp.asarray(t, jnp.float32)
        if t.shape == (rows, cols):
            return t
        return jnp.zeros((rows, cols), jnp.float32).at[:t.shape[0], :t.shape[1]].set(t)

    return {
        "obs_dim": obs_dim, "obs_p": obs_p,
        "hid_p": hid_p, "act": act, "act_p": act_p,
        "w1x": pad2(w1[:obs_dim], obs_p, hid_p),   # (OBS_P, HID_P)
        "w1a": pad2(w1[obs_dim:], act, hid_p),     # (A, HID_P)
        "b1":  pad2(b1, 1, hid_p),
        "w2":  pad2(w2, hid_p, hid_p),
        "b2":  pad2(b2, 1, hid_p),
        "wfc": pad2(wfc, hid_p, act_p),            # (HID_P, ACT_P), zero cols >= A
        "bfc": pad2(bfc, 1, act_p),
    }


def _choose_batch_tiling(batch, tile_b_max=1024):
    n_steps = pl.cdiv(batch, tile_b_max)
    # Keep >= 2 grid steps for mid/large batches so v7x's 2 TensorCores both get work
    # (no-op on v5e/v6e); don't split tiny batches below ~128-row tiles.
    if n_steps == 1 and batch >= 256:
        n_steps = 2
    tile_b = _round_up(pl.cdiv(batch, n_steps), 16)   # balanced tiles, minimal dead rows
    return tile_b, tile_b * n_steps, n_steps


def deterministic_residual_policy_forward(x, action, packed, scale, *, tile_b_max=1024):
    """out = clamp(action + scale * tanh(fc(encoder(x, action))), -1, 1)"""
    B = x.shape[0]
    obs_dim, obs_p = packed["obs_dim"], packed["obs_p"]
    act, act_p, hid_p = packed["act"], packed["act_p"], packed["hid_p"]

    x = jnp.asarray(x, jnp.float32)
    action = jnp.asarray(action, jnp.float32)

    tile_b, b_pad, n_steps = _choose_batch_tiling(B, tile_b_max)

    if (b_pad, obs_p) != x.shape:
        x_p = jnp.zeros((b_pad, obs_p), jnp.float32).at[:B, :obs_dim].set(x)
    else:
        x_p = x
    if b_pad != B:
        a_p = jnp.zeros((b_pad, act), jnp.float32).at[:B].set(action)
    else:
        a_p = action

    batch_spec = lambda cols: pl.BlockSpec((tile_b, cols), lambda i: (i, 0))
    resident = lambda shape: pl.BlockSpec(shape, lambda i: (0, 0))   # VMEM-resident

    flops = (2 * b_pad * (obs_p * hid_p + act * hid_p + hid_p * hid_p + hid_p * act_p)
             + 8 * b_pad * act)
    bytes_accessed = 4 * (x_p.size + a_p.size + b_pad * act
                          + packed["w1x"].size + packed["w1a"].size + packed["b1"].size
                          + packed["w2"].size + packed["b2"].size
                          + packed["wfc"].size + packed["bfc"].size)
    cost = pl.CostEstimate(flops=flops, transcendentals=b_pad * act,
                           bytes_accessed=bytes_accessed)

    out = pl.pallas_call(
        partial(_residual_policy_kernel, scale=float(scale), action_size=act),
        out_shape=jax.ShapeDtypeStruct((b_pad, act), jnp.float32),
        grid_spec=pltpu.PrefetchScalarGridSpec(
            num_scalar_prefetch=0,
            grid=(n_steps,),
            in_specs=[
                batch_spec(obs_p),                 # x            (tile_b, OBS_P)
                batch_spec(act),                   # action       (tile_b, A) -- unpadded
                resident(packed["w1x"].shape),     # weights/biases stay VMEM-resident
                resident(packed["w1a"].shape),
                resident(packed["b1"].shape),
                resident(packed["w2"].shape),
                resident(packed["b2"].shape),
                resident(packed["wfc"].shape),
                resident(packed["bfc"].shape),
            ],
            out_specs=batch_spec(act),             # (tile_b, A) -- tiny write traffic
        ),
        compiler_params=pltpu.CompilerParams(
            dimension_semantics=("parallel",),     # batch axis shards across v7x's 2 TCs
            vmem_limit_bytes=32 * 1024 * 1024,     # ample on v5e/v6e/v7x for these tiles
        ),
        cost_estimate=cost,
    )(x_p, a_p, packed["w1x"], packed["w1a"], packed["b1"],
      packed["w2"], packed["b2"], packed["wfc"], packed["bfc"])

    return out[:B] if b_pad != B else out


# --------------------------- reference & test harness ---------------------------

def _init_linear(key, fan_in, fan_out):
    # PyTorch-style uniform(-1/sqrt(fan_in), 1/sqrt(fan_in)); stored (in, out)
    kw, kb = jax.random.split(key)
    bound = 1.0 / math.sqrt(fan_in)
    w = jax.random.uniform(kw, (fan_in, fan_out), jnp.float32, -bound, bound)
    b = jax.random.uniform(kb, (1, fan_out), jnp.float32, -bound, bound)
    return w, b


def _reference(x, action, params, scale):
    hp = jax.lax.Precision.HIGHEST
    z = jnp.concatenate([x, action], axis=1)
    h = jnp.maximum(jnp.dot(z, params["w1"], precision=hp) + params["b1"], 0.0)
    h = jnp.maximum(jnp.dot(h, params["w2"], precision=hp) + params["b2"], 0.0)
    res = scale * jnp.tanh(jnp.dot(h, params["wfc"], precision=hp) + params["bfc"])
    return jnp.clip(action + res, -1.0, 1.0)


if __name__ == "__main__":
    B, OBS, HID, ACT = 2, 16, 32, 4
    SCALE = 0.5

    key = jax.random.PRNGKey(0)
    k_x, k_a, k1, k2, k3 = jax.random.split(key, 5)

    params = {}
    params["w1"], params["b1"] = _init_linear(k1, OBS + ACT, HID)
    params["w2"], params["b2"] = _init_linear(k2, HID, HID)
    params["wfc"], params["bfc"] = _init_linear(k3, HID, ACT)

    x = jax.random.normal(k_x, (B, OBS), jnp.float32)
    action = jax.random.uniform(k_a, (B, ACT), jnp.float32, -1.0, 1.0)

    packed = pack_residual_policy_params(params, OBS)   # once, at policy-load time
    out = deterministic_residual_policy_forward(x, action, packed, SCALE)
    jax.block_until_ready(out)

    ref = _reference(x, action, params, SCALE)
    assert out.shape == (B, ACT)
    err = float(jnp.max(jnp.abs(out - ref)))
    # Matmuls now run in f32 on the MXU; tolerance covers TPU f32-matmul pass rounding.
    assert err < 2e-2, f"mismatch vs f32 module reference, max abs err = {err}"

    print("KERNEL_OK")
</pallas_src>

<mosaic_0001>
module attributes {stable_mosaic.version = 11 : i64} {
  func.func @_residual_policy_kernel(%arg0: i32, %arg1: memref<16x16xf32, #tpu.memory_space<vmem>>, %arg2: memref<16x4xf32, #tpu.memory_space<vmem>>, %arg3: memref<16x128xf32, #tpu.memory_space<vmem>>, %arg4: memref<4x128xf32, #tpu.memory_space<vmem>>, %arg5: memref<1x128xf32, #tpu.memory_space<vmem>>, %arg6: memref<128x128xf32, #tpu.memory_space<vmem>>, %arg7: memref<1x128xf32, #tpu.memory_space<vmem>>, %arg8: memref<128x128xf32, #tpu.memory_space<vmem>>, %arg9: memref<1x128xf32, #tpu.memory_space<vmem>>, %arg10: memref<16x4xf32, #tpu.memory_space<vmem>>) attributes {dimension_semantics = [#tpu.dimension_semantics<parallel>], iteration_bounds = array<i64: 1>, scalar_prefetch = 0 : i64, scratch_operands = 0 : i64, tpu.core_type = #tpu.core_type<tc>, window_params = [{transform_indices = @transform_0, window_bounds = array<i64: 16, 16>}, {transform_indices = @transform_1, window_bounds = array<i64: 16, 4>}, {pipeline_mode = #tpu.pipeline_mode<synchronous>, transform_indices = @transform_2, window_bounds = array<i64: 16, 128>}, {pipeline_mode = #tpu.pipeline_mode<synchronous>, transform_indices = @transform_3, window_bounds = array<i64: 4, 128>}, {pipeline_mode = #tpu.pipeline_mode<synchronous>, transform_indices = @transform_4, window_bounds = array<i64: 1, 128>}, {pipeline_mode = #tpu.pipeline_mode<synchronous>, transform_indices = @transform_5, window_bounds = array<i64: 128, 128>}, {pipeline_mode = #tpu.pipeline_mode<synchronous>, transform_indices = @transform_6, window_bounds = array<i64: 1, 128>}, {pipeline_mode = #tpu.pipeline_mode<synchronous>, transform_indices = @transform_7, window_bounds = array<i64: 128, 128>}, {pipeline_mode = #tpu.pipeline_mode<synchronous>, transform_indices = @transform_8, window_bounds = array<i64: 1, 128>}, {transform_indices = @transform_9, window_bounds = array<i64: 16, 4>}]} {
    %c0 = arith.constant 0 : index
    %c0_0 = arith.constant 0 : index
    %0 = vector.load %arg1[%c0, %c0_0] : memref<16x16xf32, #tpu.memory_space<vmem>>, vector<16x16xf32>
    %c0_1 = arith.constant 0 : index
    %c0_2 = arith.constant 0 : index
    %1 = vector.load %arg2[%c0_1, %c0_2] : memref<16x4xf32, #tpu.memory_space<vmem>>, vector<16x4xf32>
    %c0_3 = arith.constant 0 : index
    %c0_4 = arith.constant 0 : index
    %2 = vector.load %arg3[%c0_3, %c0_4] : memref<16x128xf32, #tpu.memory_space<vmem>>, vector<16x128xf32>
    %cst = arith.constant dense<0.000000e+00> : vector<16x128xf32>
    %3 = tpu.matmul %0, %2, %cst {dimension_numbers = #tpu.dot_dimension_numbers<[1], [0], [0], [1], [0, 0, 1, 1], [], []>} : vector<16x16xf32>, vector<16x128xf32>, vector<16x128xf32> -> vector<16x128xf32>
    %c0_5 = arith.constant 0 : index
    %c0_6 = arith.constant 0 : index
    %4 = vector.load %arg5[%c0_5, %c0_6] : memref<1x128xf32, #tpu.memory_space<vmem>>, vector<1x128xf32>
    %5 = vector.broadcast %4 : vector<1x128xf32> to vector<16x128xf32>
    %6 = arith.addf %3, %5 : vector<16x128xf32>
    %7 = vector.extract_strided_slice %1 {offsets = [0, 0], sizes = [16, 1], strides = [1, 1]} : vector<16x4xf32> to vector<16x1xf32>
    %c0_7 = arith.constant 0 : index
    %c0_8 = arith.constant 0 : index
    %8 = vector.load %arg4[%c0_7, %c0_8] : memref<4x128xf32, #tpu.memory_space<vmem>>, vector<1x128xf32>
    %9 = vector.broadcast %7 : vector<16x1xf32> to vector<16x128xf32>
    %10 = vector.broadcast %8 : vector<1x128xf32> to vector<16x128xf32>
    %11 = arith.mulf %9, %10 : vector<16x128xf32>
    %12 = arith.addf %6, %11 : vector<16x128xf32>
    %13 = vector.extract_strided_slice %1 {offsets = [0, 1], sizes = [16, 1], strides = [1, 1]} : vector<16x4xf32> to vector<16x1xf32>
    %c1 = arith.constant 1 : index
    %c0_9 = arith.constant 0 : index
    %14 = vector.load %arg4[%c1, %c0_9] : memref<4x128xf32, #tpu.memory_space<vmem>>, vector<1x128xf32>
    %15 = vector.broadcast %13 : vector<16x1xf32> to vector<16x128xf32>
    %16 = vector.broadcast %14 : vector<1x128xf32> to vector<16x128xf32>
    %17 = arith.mulf %15, %16 : vector<16x128xf32>
    %18 = arith.addf %12, %17 : vector<16x128xf32>
    %19 = vector.extract_strided_slice %1 {offsets = [0, 2], sizes = [16, 1], strides = [1, 1]} : vector<16x4xf32> to vector<16x1xf32>
    %c2 = arith.constant 2 : index
    %c0_10 = arith.constant 0 : index
    %20 = vector.load %arg4[%c2, %c0_10] : memref<4x128xf32, #tpu.memory_space<vmem>>, vector<1x128xf32>
    %21 = vector.broadcast %19 : vector<16x1xf32> to vector<16x128xf32>
    %22 = vector.broadcast %20 : vector<1x128xf32> to vector<16x128xf32>
    %23 = arith.mulf %21, %22 : vector<16x128xf32>
    %24 = arith.addf %18, %23 : vector<16x128xf32>
    %25 = vector.extract_strided_slice %1 {offsets = [0, 3], sizes = [16, 1], strides = [1, 1]} : vector<16x4xf32> to vector<16x1xf32>
    %c3 = arith.constant 3 : index
    %c0_11 = arith.constant 0 : index
    %26 = vector.load %arg4[%c3, %c0_11] : memref<4x128xf32, #tpu.memory_space<vmem>>, vector<1x128xf32>
    %27 = vector.broadcast %25 : vector<16x1xf32> to vector<16x128xf32>
    %28 = vector.broadcast %26 : vector<1x128xf32> to vector<16x128xf32>
    %29 = arith.mulf %27, %28 : vector<16x128xf32>
    %30 = arith.addf %24, %29 : vector<16x128xf32>
    %cst_12 = arith.constant 0.000000e+00 : f32
    %31 = vector.broadcast %cst_12 : f32 to vector<16x128xf32>
    %32 = arith.maximumf %30, %31 : vector<16x128xf32>
    %c0_13 = arith.constant 0 : index
    %c0_14 = arith.constant 0 : index
    %33 = vector.load %arg6[%c0_13, %c0_14] : memref<128x128xf32, #tpu.memory_space<vmem>>, vector<128x128xf32>
    %cst_15 = arith.constant dense<0.000000e+00> : vector<16x128xf32>
    %34 = tpu.matmul %32, %33, %cst_15 {dimension_numbers = #tpu.dot_dimension_numbers<[1], [0], [0], [1], [0, 0, 1, 1], [], []>} : vector<16x128xf32>, vector<128x128xf32>, vector<16x128xf32> -> vector<16x128xf32>
    %c0_16 = arith.constant 0 : index
    %c0_17 = arith.constant 0 : index
    %35 = vector.load %arg7[%c0_16, %c0_17] : memref<1x128xf32, #tpu.memory_space<vmem>>, vector<1x128xf32>
    %36 = vector.broadcast %35 : vector<1x128xf32> to vector<16x128xf32>
    %37 = arith.addf %34, %36 : vector<16x128xf32>
    %cst_18 = arith.constant 0.000000e+00 : f32
    %38 = vector.broadcast %cst_18 : f32 to vector<16x128xf32>
    %39 = arith.maximumf %37, %38 : vector<16x128xf32>
    %c0_19 = arith.constant 0 : index
    %c0_20 = arith.constant 0 : index
    %40 = vector.load %arg8[%c0_19, %c0_20] : memref<128x128xf32, #tpu.memory_space<vmem>>, vector<128x128xf32>
    %cst_21 = arith.constant dense<0.000000e+00> : vector<16x128xf32>
    %41 = tpu.matmul %39, %40, %cst_21 {dimension_numbers = #tpu.dot_dimension_numbers<[1], [0], [0], [1], [0, 0, 1, 1], [], []>} : vector<16x128xf32>, vector<128x128xf32>, vector<16x128xf32> -> vector<16x128xf32>
    %c0_22 = arith.constant 0 : index
    %c0_23 = arith.constant 0 : index
    %42 = vector.load %arg9[%c0_22, %c0_23] : memref<1x128xf32, #tpu.memory_space<vmem>>, vector<1x128xf32>
    %43 = vector.broadcast %42 : vector<1x128xf32> to vector<16x128xf32>
    %44 = arith.addf %41, %43 : vector<16x128xf32>
    %45 = vector.extract_strided_slice %44 {offsets = [0, 0], sizes = [16, 4], strides = [1, 1]} : vector<16x128xf32> to vector<16x4xf32>
    %46 = math.tanh %45 : vector<16x4xf32>
    %cst_24 = arith.constant 5.000000e-01 : f32
    %47 = vector.broadcast %cst_24 : f32 to vector<16x4xf32>
    %48 = arith.mulf %47, %46 : vector<16x4xf32>
    %49 = arith.addf %1, %48 : vector<16x4xf32>
    %cst_25 = arith.constant -1.000000e+00 : f32
    %cst_26 = arith.constant 1.000000e+00 : f32
    %50 = vector.broadcast %cst_25 : f32 to vector<16x4xf32>
    %51 = arith.maximumf %50, %49 : vector<16x4xf32>
    %52 = vector.broadcast %cst_26 : f32 to vector<16x4xf32>
    %53 = arith.minimumf %52, %51 : vector<16x4xf32>
    %c0_27 = arith.constant 0 : index
    %c0_28 = arith.constant 0 : index
    %54 = vector.load %arg10[%c0_27, %c0_28] : memref<16x4xf32, #tpu.memory_space<vmem>>, vector<16x4xf32>
    tpu.vector_store %arg10[%c0_27, %c0_28], %53 {strides = array<i32>} : memref<16x4xf32, #tpu.memory_space<vmem>>, vector<16x4xf32>,
    return
  }
  func.func @transform_0(%arg0: i32) -> (i32, i32) {
    %c0_i32 = arith.constant 0 : i32
    %c0_i32_0 = arith.constant 0 : i32
    return %arg0, %c0_i32 : i32, i32
  }
  func.func @transform_1(%arg0: i32) -> (i32, i32) {
    %c0_i32 = arith.constant 0 : i32
    %c0_i32_0 = arith.constant 0 : i32
    return %arg0, %c0_i32 : i32, i32
  }
  func.func @transform_2(%arg0: i32) -> (i32, i32) {
    %c0_i32 = arith.constant 0 : i32
    %c0_i32_0 = arith.constant 0 : i32
    %c0_i32_1 = arith.constant 0 : i32
    return %c0_i32, %c0_i32_0 : i32, i32
  }
  func.func @transform_3(%arg0: i32) -> (i32, i32) {
    %c0_i32 = arith.constant 0 : i32
    %c0_i32_0 = arith.constant 0 : i32
    %c0_i32_1 = arith.constant 0 : i32
    return %c0_i32, %c0_i32_0 : i32, i32
  }
  func.func @transform_4(%arg0: i32) -> (i32, i32) {
    %c0_i32 = arith.constant 0 : i32
    %c0_i32_0 = arith.constant 0 : i32
    %c0_i32_1 = arith.constant 0 : i32
    return %c0_i32, %c0_i32_0 : i32, i32
  }
  func.func @transform_5(%arg0: i32) -> (i32, i32) {
    %c0_i32 = arith.constant 0 : i32
    %c0_i32_0 = arith.constant 0 : i32
    %c0_i32_1 = arith.constant 0 : i32
    return %c0_i32, %c0_i32_0 : i32, i32
  }
  func.func @transform_6(%arg0: i32) -> (i32, i32) {
    %c0_i32 = arith.constant 0 : i32
    %c0_i32_0 = arith.constant 0 : i32
    %c0_i32_1 = arith.constant 0 : i32
    return %c0_i32, %c0_i32_0 : i32, i32
  }
  func.func @transform_7(%arg0: i32) -> (i32, i32) {
    %c0_i32 = arith.constant 0 : i32
    %c0_i32_0 = arith.constant 0 : i32
    %c0_i32_1 = arith.constant 0 : i32
    return %c0_i32, %c0_i32_0 : i32, i32
  }
  func.func @transform_8(%arg0: i32) -> (i32, i32) {
    %c0_i32 = arith.constant 0 : i32
    %c0_i32_0 = arith.constant 0 : i32
    %c0_i32_1 = arith.constant 0 : i32
    return %c0_i32, %c0_i32_0 : i32, i32
  }
  func.func @transform_9(%arg0: i32) -> (i32, i32) {
    %c0_i32 = arith.constant 0 : i32
    %c0_i32_0 = arith.constant 0 : i32
    return %arg0, %c0_i32 : i32, i32
  }
}

</mosaic_0001>

<bundles_post_ra>
// kernel: tpu_custom_call.1
= control target key start
LH: loop header
LB: loop body
LE: loop exit
PB: predicated region body
PF: predicated region fallthrough
CT: control target
= control target key end

     0   :  { %14 = vsyncpa [#allocation3], 0  ;;  %s908_s0 = inlined_call_operand.vmem [shape: f32[16,16], index: 0, kind: input, shape index: {}]   ;;  %s909_s1 = inlined_call_operand.vmem [shape: f32[16,4], index: 1, kind: input, shape index: {}]   ;;  %s910_s2 = inlined_call_operand.hbm [shape: f32[16,128], index: 2, kind: input, shape index: {}]   ;;  %s911_s3 = inlined_call_operand.vmem [shape: f32[4,128], index: 3, kind: input, shape index: {}]   ;;  %s912_s4 = inlined_call_operand.vmem [shape: f32[1,128], index: 4, kind: input, shape index: {}]   ;;  %s913_s5 = inlined_call_operand.hbm [shape: f32[128,128], index: 5, kind: input, shape index: {}]   ;;  %s914_s6 = inlined_call_operand.vmem [shape: f32[1,128], index: 6, kind: input, shape index: {}]   ;;  %s915_s7 = inlined_call_operand.hbm [shape: f32[128,128], index: 7, kind: input, shape index: {}]   ;;  %s916_s8 = inlined_call_operand.vmem [shape: f32[1,128], index: 8, kind: input, shape index: {}]   ;;  %s917_s9 = inlined_call_operand.vmem [shape: f32[16,4], index: 9, kind: output, shape index: {}]  }
   0x1   :  { %15 = vsyncpa [#allocation5], 0  ;;  %s742_s30 = smov [#allocation4]   ;;  %s743_s11 = smov [#allocation2]  }
   0x2   :  { %s41_s10 = sshll.u32 %s742_s30, 4  ;;  %s25_s12 = sshll.u32 %s743_s11, 4  ;;  %s42_s10 = int_to_ptr.vmem [resolvable:$true] %s41_s10  ;;  %s801_s12 = int_to_ptr.vmem [resolvable:$true] %s25_s12 }
   0x3   :  { %s672_s15 = scalar_lea.hbm %s913_s5, 2048 }
   0x4   :  { %p673_p0 = scmp.ne.s32.totalorder %s913_s5, %s672_s15  ;;  %p676_p1 = scmp.lt.u32.totalorder %s672_s15, %s913_s5 }
   0x6   :  { %p678_p2 = pnand %p676_p1, %p673_p0 }
   0x8   :  { %681 = shalt.err (!%p678_p2)
}
   0x9   :  { %s682_s20 = scalar_lea.vmem %s42_s10, 2048  ;;  %p687_p4 = scmp.lt.s32.totalorder %s42_s10, %s42_s10 }
   0xa   :  { %p683_p3 = scmp.ne.s32.totalorder %s42_s10, %s682_s20  ;;  %p688_p5 = scmp.lt.s32.totalorder %s682_s20, %s682_s20 }
   0xc   :  { %p689_p6 = por %p688_p5, %p687_p4 }
   0xe   :  { %p690_p7 = pnand %p689_p6, %p683_p3 }
  0x10   :  { %693 = shalt.err (!%p690_p7)
}
  0x11   :  { %s744_s21 = smov 128   ;;  %s745_s22 = smov 8  }
  0x12   :  { %47 = dma.hbm_to_vmem [thread:$0]  %s913_s5, 2048, %s42_s10, [#allocation5], %s744_s21, %s744_s21, %s745_s22  }
  0x13   :  { %s694_s27 = scalar_lea.hbm %s910_s2, 256 }
  0x14   :  { %p695_p8 = scmp.ne.s32.totalorder %s910_s2, %s694_s27  ;;  %p698_p9 = scmp.lt.u32.totalorder %s694_s27, %s910_s2 }
  0x16   :  { %p700_p10 = pnand %p698_p9, %p695_p8 }
  0x18   :  { %703 = shalt.err (!%p700_p10)
}
  0x19   :  { %s704_s13 = scalar_lea.vmem %s801_s12, 256  ;;  %p709_p12 = scmp.lt.s32.totalorder %s801_s12, %s801_s12 }
  0x1a   :  { %p705_p11 = scmp.ne.s32.totalorder %s801_s12, %s704_s13  ;;  %p710_p13 = scmp.lt.s32.totalorder %s704_s13, %s704_s13 }
  0x1c   :  { %p711_p0 = por %p710_p13, %p709_p12 }
  0x1e   :  { %p712_p1 = pnand %p711_p0, %p705_p11 }
  0x20   :  { %715 = shalt.err (!%p712_p1)
}
  0x21   :  { %31 = dma.hbm_to_vmem [thread:$0]  %s910_s2, 256, %s801_s12, [#allocation3], %s744_s21, %s744_s21, %s745_s22  }
  0x22   :  { %s746_s14 = smov [#allocation6]   ;;  %s716_s18 = scalar_lea.hbm %s915_s7, 2048 }
  0x23   :  { %s55_s15 = sshll.u32 %s746_s14, 4  ;;  %p717_p2 = scmp.ne.s32.totalorder %s915_s7, %s716_s18  ;;  %s56_s15 = int_to_ptr.vmem [resolvable:$true] %s55_s15 }
  0x24   :  { %p720_p3 = scmp.lt.u32.totalorder %s716_s18, %s915_s7 }
  0x26   :  { %p722_p4 = pnand %p720_p3, %p717_p2 }
  0x28   :  { %725 = shalt.err (!%p722_p4)
}
  0x29   :  { %s726_s25 = scalar_lea.vmem %s56_s15, 2048  ;;  %p731_p6 = scmp.lt.s32.totalorder %s56_s15, %s56_s15 }
  0x2a   :  { %p727_p5 = scmp.ne.s32.totalorder %s56_s15, %s726_s25  ;;  %p732_p7 = scmp.lt.s32.totalorder %s726_s25, %s726_s25 }
  0x2c   :  { %p733_p8 = por %p732_p7, %p731_p6 }
  0x2e   :  { %p734_p9 = pnand %p733_p8, %p727_p5 }
  0x30   :  { %737 = shalt.err (!%p734_p9)
}
  0x31   :  { %61 = dma.hbm_to_vmem [thread:$0]  %s915_s7, 2048, %s56_s15, [#allocation5], %s744_s21, %s744_s21, %s745_s22  }
  0x32   :  { %738 = dma.done.wait [#allocation3], 256  }
  0x33   :  { %739 = vsyncadd [#allocation3], 4294967040 }
  0x34   :  { %740 = dma.done.wait [#allocation5], 4096  }
  0x35   :  { %741 = vsyncadd [#allocation5], 4294963200  ;;  %v747_v0 = vmov 1   ;;  %v748_v1 = vmov 0   ;;  %vm86_vm0 = vcmask 130048   ;;  %v77_v2 = vld [vmem:[#allocation2] sm:$0xff] }
  0x36   :  { %663 = vset.pattern.permute.xlu1 %v747_v0  ;;  %662 = vset.pattern.permute.xlu0 %v748_v1  ;;  %v78_v3 = vld [vmem:[#allocation2 + $0x8] sm:$0xff]  ;;  %v73_v4 = vld [vmem:[%s908_s0] sm:$0xff]  ;;  %v240_v7 = vld [vmem:[#allocation4] sm:$0xff]  ;;  %v749_v18 = vmov 2   ;;  %v750_v22 = vmov 3   ;;  %vm448_vm1 = vcmask 31744  }
  0x37   :  { %v585_v5 = vpack.c.bf16 %v78_v3, %v77_v2  ;;  %512 = vmatprep.mubr.msk.f32.mxu0 %vm86_vm0, %v73_v4  ;;  %v860_v6 = vld [vmem:[%s909_s1] sm:$0xff]  ;;  %v241_v8 = vld [vmem:[#allocation4 + $0x8] sm:$0xff]  ;;  %v867_v10 = vld [vmem:[%s909_s1 + $0x8] sm:$0xff] }
  0x38   :  { %189 = vperm.xlu1 %663, %v860_v6   ;;  %171 = vperm.xlu0 %662, %v860_v6   ;;  %v242_v9 = vld [vmem:[#allocation4 + $0x10] sm:$0xff]  ;;  %v589_v11 = vpack.c.bf16 %v241_v8, %v240_v7  ;;  %v243_v12 = vld [vmem:[#allocation4 + $0x18] sm:$0xff]  ;;  %v244_v15 = vld [vmem:[#allocation4 + $0x20] sm:$0xff] }
  0x39   :  { %586 = vmatprep.subr.bf16.mxu0 %v585_v5  ;;  %v74_v13 = vld [vmem:[%s908_s0 + $0x8] sm:$0xff]  ;;  %v593_v14 = vpack.c.bf16 %v243_v12, %v242_v9  ;;  %v245_v16 = vld [vmem:[#allocation4 + $0x28] sm:$0xff]  ;;  %v246_v19 = vld [vmem:[#allocation4 + $0x30] sm:$0xff] }
  0x3a   :  { %588 = vmatpush3.bf16.msra.mxu0 %v585_v5  ;;  %590 = vmatprep.subr.bf16.mxu1 %v589_v11  ;;  %v597_v17 = vpack.c.bf16 %v245_v16, %v244_v15  ;;  %v247_v20 = vld [vmem:[#allocation4 + $0x38] sm:$0xff]  ;;  %v248_v23 = vld [vmem:[#allocation4 + $0x40] sm:$0xff]  ;;  %v249_v24 = vld [vmem:[#allocation4 + $0x48] sm:$0xff] }
  0x3b   :  { %592 = vmatpush3.bf16.msra.mxu1 %v589_v11  ;;  %v601_v21 = vpack.c.bf16 %v247_v20, %v246_v19  ;;  %v605_v25 = vpack.c.bf16 %v249_v24, %v248_v23  ;;  %v250_v26 = vld [vmem:[#allocation4 + $0x50] sm:$0xff]  ;;  %v251_v27 = vld [vmem:[#allocation4 + $0x58] sm:$0xff]  ;;  %v252_v29 = vld [vmem:[#allocation4 + $0x60] sm:$0xff] }
  0x3c   :  { %193 = vperm.xlu1 %663, %v867_v10   ;;  %176 = vperm.xlu0 %662, %v867_v10   ;;  %v609_v28 = vpack.c.bf16 %v251_v27, %v250_v26  ;;  %v253_v30 = vld [vmem:[#allocation4 + $0x68] sm:$0xff]  ;;  %v254_v32 = vld [vmem:[#allocation4 + $0x70] sm:$0xff]  ;;  %v255_v33 = vld [vmem:[#allocation4 + $0x78] sm:$0xff] }
  0x3d   :  { %513 = vmatmul.mubr.msk.f32.vlgmr.msra.gmra.mrb[0].mxu0 %vm86_vm0, %v74_v13  ;;  %594 = vmatprep.subr.bf16.mxu1 %v593_v14  ;;  %v613_v31 = vpack.c.bf16 %v253_v30, %v252_v29  ;;  %v617_v34 = vpack.c.bf16 %v255_v33, %v254_v32  ;;  %v340_v35 = vld [vmem:[#allocation6] sm:$0xff]  ;;  %v341_v36 = vld [vmem:[#allocation6 + $0x8] sm:$0xff]  ;;  %v342_v37 = vld [vmem:[#allocation6 + $0x10] sm:$0xff] }
  0x3e   :  { %v621_v38 = vpack.c.bf16 %v341_v36, %v340_v35  ;;  %v343_v39 = vld [vmem:[#allocation6 + $0x18] sm:$0xff]  ;;  %v344_v41 = vld [vmem:[#allocation6 + $0x20] sm:$0xff]  ;;  %v345_v42 = vld [vmem:[#allocation6 + $0x28] sm:$0xff] }
  0x3f   :  { %596 = vmatpush3.bf16.msra.mxu1 %v593_v14  ;;  %v625_v40 = vpack.c.bf16 %v343_v39, %v342_v37  ;;  %v629_v43 = vpack.c.bf16 %v345_v42, %v344_v41  ;;  %v346_v44 = vld [vmem:[#allocation6 + $0x30] sm:$0xff]  ;;  %v347_v45 = vld [vmem:[#allocation6 + $0x38] sm:$0xff]  ;;  %v348_v47 = vld [vmem:[#allocation6 + $0x40] sm:$0xff] }
  0x40   :  { %664 = vset.pattern.permute.xlu0 %v749_v18  ;;  %665 = vset.pattern.permute.xlu1 %v749_v18  ;;  %v633_v46 = vpack.c.bf16 %v347_v45, %v346_v44  ;;  %v349_v48 = vld [vmem:[#allocation6 + $0x48] sm:$0xff]  ;;  %v350_v50 = vld [vmem:[#allocation6 + $0x50] sm:$0xff]  ;;  %v351_v51 = vld [vmem:[#allocation6 + $0x58] sm:$0xff] }
  0x41   :  { %206 = vperm.xlu0 %664, %v860_v6   ;;  %210 = vperm.xlu1 %665, %v867_v10   ;;  %v637_v49 = vpack.c.bf16 %v349_v48, %v348_v47  ;;  %v641_v52 = vpack.c.bf16 %v351_v51, %v350_v50  ;;  %v352_v53 = vld [vmem:[#allocation6 + $0x60] sm:$0xff]  ;;  %v353_v54 = vld [vmem:[#allocation6 + $0x68] sm:$0xff]  ;;  %v460_v62 = vld [vmem:[%s911_s3] ss:$0 sm:$0xff] }
  0x42   :  { %598 = vmatprep.subr.bf16.mxu1 %v597_v17  ;;  %622 = vmatprep.subr.bf16.mxu0 %v621_v38  ;;  %v645_v55 = vpack.c.bf16 %v353_v54, %v352_v53  ;;  %v457_v63 = vld [vmem:[%s912_s4] ss:$0 sm:$0xff]  ;;  %v461_v0 = vld [vmem:[%s911_s3 + $0x1] ss:$0 sm:$0xff]  ;;  %v462_v8 = vld [vmem:[%s911_s3 + $0x2] ss:$0 sm:$0xff] }
  0x43   :  { %600 = vmatpush3.bf16.msra.mxu1 %v597_v17  ;;  %624 = vmatpush3.bf16.msra.mxu0 %v621_v38  ;;  %v463_v9 = vld [vmem:[%s911_s3 + $0x3] ss:$0 sm:$0xff]  ;;  %v355_v30 = vld [vmem:[#allocation6 + $0x78] sm:$0xff]  ;;  %v464_v32 = vld [vmem:[%s914_s6] ss:$0 sm:$0xff] }
  0x44   :  { %602 = vmatprep.subr.bf16.mxu1 %v601_v21  ;;  %626 = vmatprep.subr.bf16.mxu0 %v625_v40  ;;  %v354_v29 = vld [vmem:[#allocation6 + $0x70] sm:$0xff] }
  0x45   :  { %667 = vset.pattern.permute.xlu0 %v750_v22  ;;  %666 = vset.pattern.permute.xlu1 %v750_v22  ;;  %v465_v39 = vld [vmem:[%s916_s8] ss:$0 sm:$0xff] }
  0x46   :  { %227 = vperm.xlu0 %667, %v867_v10   ;;  %223 = vperm.xlu1 %666, %v860_v6  }
  0x47   :  { %604 = vmatpush3.bf16.msra.mxu1 %v601_v21  ;;  %628 = vmatpush3.bf16.msra.mxu0 %v625_v40 }
  0x48   :  { %606 = vmatprep.subr.bf16.mxu1 %v605_v25  ;;  %630 = vmatprep.subr.bf16.mxu0 %v629_v43 }
  0x4b   :  { %608 = vmatpush3.bf16.msra.mxu1 %v605_v25  ;;  %632 = vmatpush3.bf16.msra.mxu0 %v629_v43 }
  0x4c   :  { %610 = vmatprep.subr.bf16.mxu1 %v609_v28  ;;  %634 = vmatprep.subr.bf16.mxu0 %v633_v46 }
  0x4f   :  { %612 = vmatpush3.bf16.msra.mxu1 %v609_v28  ;;  %636 = vmatpush3.bf16.msra.mxu0 %v633_v46 }
  0x50   :  { %614 = vmatprep.subr.bf16.mxu1 %v613_v31  ;;  %638 = vmatprep.subr.bf16.mxu0 %v637_v49 }
  0x53   :  { %616 = vmatpush3.bf16.msra.mxu1 %v613_v31  ;;  %640 = vmatpush3.bf16.msra.mxu0 %v637_v49  ;;  %v649_v31 = vpack.c.bf16 %v355_v30, %v354_v29 }
  0x54   :  { %618 = vmatprep.subr.bf16.mxu1 %v617_v34  ;;  %642 = vmatprep.subr.bf16.mxu0 %v641_v52 }
  0x57   :  { %620 = vmatpush3.bf16.msra.mxu1 %v617_v34  ;;  %644 = vmatpush3.bf16.msra.mxu0 %v641_v52 }
  0x58   :  { %646 = vmatprep.subr.bf16.mxu0 %v645_v55 }
  0x5b   :  { %648 = vmatpush3.bf16.msra.mxu0 %v645_v55 }
  0x5c   :  { %650 = vmatprep.subr.bf16.mxu0 %v649_v31 }
  0x5f   :  { %652 = vmatpush3.bf16.msra.mxu0 %v649_v31 }
  0xb7   :  { %v172_v56 = vpop.permute.xlu0 %171  ;;  %v190_v57 = vpop.permute.xlu1 %189 }
  0xb8   :  { %v183_v5 = vmul.f32 %v460_v62, %v172_v56  ;;  %v200_v15 = vmul.f32 %v461_v0, %v190_v57 }
  0xbb   :  { %v177_v58 = vpop.permute.xlu0 %176  ;;  %v194_v59 = vpop.permute.xlu1 %193 }
  0xbc   :  { %v184_v2 = vmul.f32 %v460_v62, %v177_v58  ;;  %v201_v12 = vmul.f32 %v461_v0, %v194_v59 }
  0xc0   :  { %v207_v60 = vpop.permute.xlu0 %206  ;;  %v211_v61 = vpop.permute.xlu1 %210 }
  0xc1   :  { %v218_v18 = vmul.f32 %v462_v8, %v211_v61  ;;  %v217_v20 = vmul.f32 %v462_v8, %v207_v60 }
  0xc5   :  { %v228_v11 = vpop.permute.xlu0 %227  ;;  %v224_v14 = vpop.permute.xlu1 %223 }
  0xc6   :  { %v235_v19 = vmul.f32 %v463_v9, %v228_v11  ;;  %v234_v21 = vmul.f32 %v463_v9, %v224_v14 }
 0x110   :  { %v514_v1 = vpop.f32.mrb[0].mxu0 }
 0x111   :  { %v165_v3 = vadd.f32 %v514_v1, %v457_v63  ;;  %v159_v4 = vpop.f32.mrb[1].mxu0 }
 0x112   :  { %v160_v7 = vadd.f32 %v457_v63, %v159_v4 }
 0x113   :  { %v186_v13 = vadd.f32 %v184_v2, %v165_v3 }
 0x114   :  { %v185_v16 = vadd.f32 %v183_v5, %v160_v7 }
 0x115   :  { %v203_v17 = vadd.f32 %v201_v12, %v186_v13 }
 0x116   :  { %v202_v22 = vadd.f32 %v200_v15, %v185_v16 }
 0x117   :  { %v220_v23 = vadd.f32 %v218_v18, %v203_v17 }
 0x118   :  { %v219_v24 = vadd.f32 %v217_v20, %v202_v22 }
 0x119   :  { %v237_v25 = vadd.f32 %v235_v19, %v220_v23 }
 0x11a   :  { %v236_v26 = vadd.f32 %v234_v21, %v219_v24 }
 0x11b   :  { %v239_v28 = vmax.f32 %v237_v25, 0.0 }
 0x11c   :  { %v238_v27 = vmax.f32 %v236_v26, 0.0 }
 0x11e   :  { %547 = vmatprep.mubr.f32.mxu1 %v238_v27 }
 0x11f   :  { %548 = vmatmul.mubr.f32.vlgmr.msra.gmra.mrb[0].mxu1 %v239_v28 }
 0x1f2   :  { %v549_v33 = vpop.f32.mrb[0].mxu1 }
 0x1f3   :  { %v335_v34 = vadd.f32 %v549_v33, %v464_v32  ;;  %v329_v35 = vpop.f32.mrb[1].mxu1 }
 0x1f4   :  { %v330_v36 = vadd.f32 %v464_v32, %v329_v35 }
 0x1f5   :  { %v339_v38 = vmax.f32 %v335_v34, 0.0 }
 0x1f6   :  { %v338_v37 = vmax.f32 %v330_v36, 0.0 }
 0x1f8   :  { %582 = vmatprep.mubr.f32.mxu0 %v338_v37 }
 0x1f9   :  { %583 = vmatmul.mubr.f32.vlgmr.msra.gmra.mrb[2].mxu0 %v339_v38 }
 0x2cc   :  { %v584_v40 = vpop.f32.mrb[2].mxu0 }
 0x2cd   :  { %v435_v41 = vadd.f32 %v584_v40, %v465_v39  ;;  %v429_v42 = vpop.f32.mrb[3].mxu0 }
 0x2ce   :  { %v430_v43 = vadd.f32 %v465_v39, %v429_v42 }
 0x2cf   :  { %668 = vtanh.f32 %v435_v41 }
 0x2d0   :  { %670 = vtanh.f32 %v430_v43 }
 0x2d9   :  { %v669_v44 = vpop.eup %668 }
 0x2da   :  { %v671_v45 = vpop.eup %670  ;;  %v441_v46 = vmul.f32 0.5, %v669_v44 }
 0x2db   :  { %v440_v47 = vmul.f32 0.5, %v671_v45 }
 0x2dc   :  { %v443_v48 = vadd.f32 %v441_v46, %v867_v10 }
 0x2dd   :  { %v442_v49 = vadd.f32 %v440_v47, %v860_v6 }
 0x2de   :  { %v467_v50 = vclamps-f32 %v443_v48, 1.0 }
 0x2df   :  { %v466_v51 = vclamps-f32 %v442_v49, 1.0 }
 0x2e0   :  { %450 = vst.msk [vmem:[%s917_s9 + $0x8] sm:$0xff] %vm448_vm1, %v467_v50 }
 0x2e1   :  { %449 = vst.msk [vmem:[%s917_s9] sm:$0xff] %vm448_vm1, %v466_v51 }
 0x2e2   :  { %455 = vsyncpa [#allocation3], 1 }
 0x2e3   :  { %456 = vsyncpa [#allocation5], 1 }

</bundles_post_ra>
